<compile_context>
chip_gen: v5e
topology: v5e:2x2
jax: 0.10.0
libtpu: 0.0.40
codegen_flags: <defaults>
</compile_context>

<pallas_src>
import math

import jax
import jax.numpy as jnp
from jax import lax
from jax.experimental import pallas as pl
from jax.experimental.pallas import tpu as pltpu


def rnn_kernel(x_ref, whx_ref, whh_t_ref, bh_ref, wox_ref, woh_t_ref, bo_ref,
               h0_ref, out_ref, xhb_ref):
    """Recurrent hot loop with everything resident in VMEM.

    Shapes (L = 2*B fused batch*coord):
      x_ref:     (T, L, 1)   time-major inputs
      whx_ref:   (1, H)      x column of W_h
      whh_t_ref: (H, H)      recurrent block of W_h, transposed
      bh_ref:    (1, H)
      wox_ref:   (1, O)      x column of W_o
      woh_t_ref: (H, O)      hidden block of W_o, transposed
      bo_ref:    (1, O)
      h0_ref:    (L, H)      initial hidden state
      out_ref:   (L, O)      output of the last timestep
      xhb_ref:   (T, L, H)   VMEM scratch: precomputed x-contribution + b_h
    """
    T = x_ref.shape[0]

    # Hoisted out of the loop: x-contribution + hidden bias for every timestep.
    # (T, L, 1) * (1, 1, H) + (1, 1, H) -> (T, L, H); one VPU broadcast-multiply.
    xhb_ref[...] = (x_ref[...] * whx_ref[...][None, :, :]
                    + bh_ref[...][None, :, :])

    whh_t = whh_t_ref[...]  # (H, H): recurrent weight, loaded once and reused.

    def step(t, h_prev):
        # Pure recurrence: h_t = tanh(h_prev @ W_hh^T + (w_hx * x_t + b_h))
        return jnp.tanh(
            jnp.dot(h_prev, whh_t, preferred_element_type=jnp.float32)
            + xhb_ref[t])

    # Only the first T-1 steps feed the hidden state that the final output uses
    # (PyTorch computes output_t from H_prev BEFORE the update at step t).
    h_last = lax.fori_loop(0, T - 1, step, h0_ref[...], unroll=True)

    # Output projection, executed once (only the last timestep is returned).
    out_ref[...] = (
        jnp.dot(h_last, woh_t_ref[...], preferred_element_type=jnp.float32)
        + x_ref[T - 1] * wox_ref[...]
        + bo_ref[...])


def vanilla_rnn_forward(x, h0, wh, bh, wo, bo):
    """x: (B, T, 2) f32, h0: (B, H, 2) f32. Returns (B, O, 2) f32."""
    B, T, C = x.shape
    H = h0.shape[1]
    O = wo.shape[0]
    L = B * C
    assert T >= 1, "T=0 would return the (dead-code) kaiming-init output tensor"

    # Re-layout to the kernel's time-major / (2B, H) form. Column-equivalent
    # fused index j = b*C + c identifies one independent RNN "column".
    x_k = jnp.transpose(x, (1, 0, 2)).reshape(T, L, 1)     # (T, 2B, 1)
    h0_k = jnp.transpose(h0, (0, 2, 1)).reshape(L, H)      # (2B, H)

    # One-time parameter splits (concat-free recurrence).
    whx = wh[:, :1].T        # (1, H)
    whh_t = wh[:, 1:].T      # (H, H)
    bh_row = bh.T            # (1, H)
    wox = wo[:, :1].T        # (1, O)
    woh_t = wo[:, 1:].T      # (H, O)
    bo_row = bo.T            # (1, O)

    out_k = pl.pallas_call(
        rnn_kernel,
        out_shape=jax.ShapeDtypeStruct((L, O), jnp.float32),
        in_specs=[pl.BlockSpec(memory_space=pltpu.MemorySpace.VMEM)] * 8,
        out_specs=pl.BlockSpec(memory_space=pltpu.MemorySpace.VMEM),
        scratch_shapes=[pltpu.VMEM((T, L, H), jnp.float32)],
    )(x_k, whx, whh_t, bh_row, wox, woh_t, bo_row, h0_k)

    # (2B, O) -> (B, O, 2), matching the PyTorch output layout.
    return jnp.transpose(out_k.reshape(B, C, O), (0, 2, 1))


def vanilla_rnn_reference(x, h0, wh, bh, wo, bo):
    """Pure-JAX reference mirroring the PyTorch loop exactly (sanity check)."""
    B, T, C = x.shape
    h_prev = h0
    out = None
    for t in range(T):
        x_t = x[:, t][:, None, :]                                  # (B, 1, 2)
        combined = jnp.concatenate([x_t, h_prev], axis=1)          # (B, 1+H, 2)
        h_t = jnp.tanh(jnp.einsum("hk,bkc->bhc", wh, combined) + bh[None])
        out = jnp.einsum("ok,bkc->boc", wo, combined) + bo[None]
        h_prev = h_t
    return out


if __name__ == "__main__":
    # Small shapes implied by the module: input_dim=1, hidden=32, output_dim=4.
    B, T, C = 2, 8, 2
    HIDDEN = 32
    OUT = 4
    IN_FEAT = 1 + HIDDEN  # input_dim + hidden_dim

    key = jax.random.PRNGKey(0)
    kx, kwh, kbh, kwo, kbo, kh0 = jax.random.split(key, 6)

    x = jax.random.normal(kx, (B, T, C), dtype=jnp.float32)

    # Parameters: uniform(-0.2, 0.2), matching VanillaRNNlinear.__init__ shapes.
    wh = jax.random.uniform(kwh, (HIDDEN, IN_FEAT), jnp.float32, -0.2, 0.2)
    bh = jax.random.uniform(kbh, (HIDDEN, 1), jnp.float32, -0.2, 0.2)
    wo = jax.random.uniform(kwo, (OUT, IN_FEAT), jnp.float32, -0.2, 0.2)
    bo = jax.random.uniform(kbo, (OUT, 1), jnp.float32, -0.2, 0.2)

    # Initial hidden state: kaiming_normal_ on a (B, H, 2) tensor =>
    # N(0, std) with std = sqrt(2 / fan_in), fan_in = H * 2.
    # (Deterministic synthetic init; exact torch RNG stream not reproduced.)
    h0 = jax.random.normal(kh0, (B, HIDDEN, C), jnp.float32) * math.sqrt(2.0 / (HIDDEN * C))
    # The kaiming init of `output` in forward() is dead code for T >= 1 (always overwritten).

    out = jax.block_until_ready(vanilla_rnn_forward(x, h0, wh, bh, wo, bo))
    ref = vanilla_rnn_reference(x, h0, wh, bh, wo, bo)

    assert out.shape == (B, OUT, C), out.shape
    assert jnp.allclose(out, ref, atol=1e-5, rtol=1e-5), float(jnp.max(jnp.abs(out - ref)))

    print("KERNEL_OK")
</pallas_src>

<mosaic_0001>
module attributes {stable_mosaic.version = 11 : i64} {
  func.func @rnn_kernel(%arg0: memref<8x4x1xf32, #tpu.memory_space<vmem>>, %arg1: memref<1x32xf32, #tpu.memory_space<vmem>>, %arg2: memref<32x32xf32, #tpu.memory_space<vmem>>, %arg3: memref<1x32xf32, #tpu.memory_space<vmem>>, %arg4: memref<1x4xf32, #tpu.memory_space<vmem>>, %arg5: memref<32x4xf32, #tpu.memory_space<vmem>>, %arg6: memref<1x4xf32, #tpu.memory_space<vmem>>, %arg7: memref<4x32xf32, #tpu.memory_space<vmem>>, %arg8: memref<4x4xf32, #tpu.memory_space<vmem>>, %arg9: memref<8x4x32xf32, #tpu.memory_space<vmem>>) attributes {dimension_semantics = [], scalar_prefetch = 0 : i64, scratch_operands = 1 : i64, tpu.core_type = #tpu.core_type<tc>} {
    %c0 = arith.constant 0 : index
    %c0_0 = arith.constant 0 : index
    %c0_1 = arith.constant 0 : index
    %0 = vector.load %arg0[%c0, %c0_0, %c0_1] : memref<8x4x1xf32, #tpu.memory_space<vmem>>, vector<8x4x1xf32>
    %c0_2 = arith.constant 0 : index
    %c0_3 = arith.constant 0 : index
    %1 = vector.load %arg1[%c0_2, %c0_3] : memref<1x32xf32, #tpu.memory_space<vmem>>, vector<1x32xf32>
    %2 = vector.shape_cast %1 : vector<1x32xf32> to vector<1x1x32xf32>
    %3 = vector.broadcast %0 : vector<8x4x1xf32> to vector<8x4x32xf32>
    %4 = vector.broadcast %2 : vector<1x1x32xf32> to vector<8x4x32xf32>
    %5 = arith.mulf %3, %4 : vector<8x4x32xf32>
    %c0_4 = arith.constant 0 : index
    %c0_5 = arith.constant 0 : index
    %6 = vector.load %arg3[%c0_4, %c0_5] : memref<1x32xf32, #tpu.memory_space<vmem>>, vector<1x32xf32>
    %7 = vector.shape_cast %6 : vector<1x32xf32> to vector<1x1x32xf32>
    %8 = vector.broadcast %7 : vector<1x1x32xf32> to vector<8x4x32xf32>
    %9 = arith.addf %5, %8 : vector<8x4x32xf32>
    %c0_6 = arith.constant 0 : index
    %c0_7 = arith.constant 0 : index
    %c0_8 = arith.constant 0 : index
    %10 = vector.load %arg9[%c0_6, %c0_7, %c0_8] : memref<8x4x32xf32, #tpu.memory_space<vmem>>, vector<8x4x32xf32>
    tpu.vector_store %arg9[%c0_6, %c0_7, %c0_8], %9 {strides = array<i32>} : memref<8x4x32xf32, #tpu.memory_space<vmem>>, vector<8x4x32xf32>,
    %c0_9 = arith.constant 0 : index
    %c0_10 = arith.constant 0 : index
    %11 = vector.load %arg2[%c0_9, %c0_10] : memref<32x32xf32, #tpu.memory_space<vmem>>, vector<32x32xf32>
    %c0_11 = arith.constant 0 : index
    %c0_12 = arith.constant 0 : index
    %12 = vector.load %arg7[%c0_11, %c0_12] : memref<4x32xf32, #tpu.memory_space<vmem>>, vector<4x32xf32>
    %c0_i32 = arith.constant 0 : i32
    %cst = arith.constant dense<0.000000e+00> : vector<4x32xf32>
    %13 = tpu.matmul %12, %11, %cst {dimension_numbers = #tpu.dot_dimension_numbers<[1], [0], [0], [1], [0, 0, 1, 1], [], []>} : vector<4x32xf32>, vector<32x32xf32>, vector<4x32xf32> -> vector<4x32xf32>
    %14 = arith.index_cast %c0_i32 : i32 to index
    %c0_13 = arith.constant 0 : index
    %c0_14 = arith.constant 0 : index
    %15 = vector.load %arg9[%14, %c0_13, %c0_14] : memref<8x4x32xf32, #tpu.memory_space<vmem>>, vector<1x4x32xf32>
    %16 = vector.shape_cast %15 : vector<1x4x32xf32> to vector<4x32xf32>
    %17 = arith.addf %13, %16 : vector<4x32xf32>
    %18 = math.tanh %17 : vector<4x32xf32>
    %c1_i32 = arith.constant 1 : i32
    %cst_15 = arith.constant dense<0.000000e+00> : vector<4x32xf32>
    %19 = tpu.matmul %18, %11, %cst_15 {dimension_numbers = #tpu.dot_dimension_numbers<[1], [0], [0], [1], [0, 0, 1, 1], [], []>} : vector<4x32xf32>, vector<32x32xf32>, vector<4x32xf32> -> vector<4x32xf32>
    %20 = arith.index_cast %c1_i32 : i32 to index
    %c0_16 = arith.constant 0 : index
    %c0_17 = arith.constant 0 : index
    %21 = vector.load %arg9[%20, %c0_16, %c0_17] : memref<8x4x32xf32, #tpu.memory_space<vmem>>, vector<1x4x32xf32>
    %22 = vector.shape_cast %21 : vector<1x4x32xf32> to vector<4x32xf32>
    %23 = arith.addf %19, %22 : vector<4x32xf32>
    %24 = math.tanh %23 : vector<4x32xf32>
    %c2_i32 = arith.constant 2 : i32
    %cst_18 = arith.constant dense<0.000000e+00> : vector<4x32xf32>
    %25 = tpu.matmul %24, %11, %cst_18 {dimension_numbers = #tpu.dot_dimension_numbers<[1], [0], [0], [1], [0, 0, 1, 1], [], []>} : vector<4x32xf32>, vector<32x32xf32>, vector<4x32xf32> -> vector<4x32xf32>
    %26 = arith.index_cast %c2_i32 : i32 to index
    %c0_19 = arith.constant 0 : index
    %c0_20 = arith.constant 0 : index
    %27 = vector.load %arg9[%26, %c0_19, %c0_20] : memref<8x4x32xf32, #tpu.memory_space<vmem>>, vector<1x4x32xf32>
    %28 = vector.shape_cast %27 : vector<1x4x32xf32> to vector<4x32xf32>
    %29 = arith.addf %25, %28 : vector<4x32xf32>
    %30 = math.tanh %29 : vector<4x32xf32>
    %c3_i32 = arith.constant 3 : i32
    %cst_21 = arith.constant dense<0.000000e+00> : vector<4x32xf32>
    %31 = tpu.matmul %30, %11, %cst_21 {dimension_numbers = #tpu.dot_dimension_numbers<[1], [0], [0], [1], [0, 0, 1, 1], [], []>} : vector<4x32xf32>, vector<32x32xf32>, vector<4x32xf32> -> vector<4x32xf32>
    %32 = arith.index_cast %c3_i32 : i32 to index
    %c0_22 = arith.constant 0 : index
    %c0_23 = arith.constant 0 : index
    %33 = vector.load %arg9[%32, %c0_22, %c0_23] : memref<8x4x32xf32, #tpu.memory_space<vmem>>, vector<1x4x32xf32>
    %34 = vector.shape_cast %33 : vector<1x4x32xf32> to vector<4x32xf32>
    %35 = arith.addf %31, %34 : vector<4x32xf32>
    %36 = math.tanh %35 : vector<4x32xf32>
    %c4_i32 = arith.constant 4 : i32
    %cst_24 = arith.constant dense<0.000000e+00> : vector<4x32xf32>
    %37 = tpu.matmul %36, %11, %cst_24 {dimension_numbers = #tpu.dot_dimension_numbers<[1], [0], [0], [1], [0, 0, 1, 1], [], []>} : vector<4x32xf32>, vector<32x32xf32>, vector<4x32xf32> -> vector<4x32xf32>
    %38 = arith.index_cast %c4_i32 : i32 to index
    %c0_25 = arith.constant 0 : index
    %c0_26 = arith.constant 0 : index
    %39 = vector.load %arg9[%38, %c0_25, %c0_26] : memref<8x4x32xf32, #tpu.memory_space<vmem>>, vector<1x4x32xf32>
    %40 = vector.shape_cast %39 : vector<1x4x32xf32> to vector<4x32xf32>
    %41 = arith.addf %37, %40 : vector<4x32xf32>
    %42 = math.tanh %41 : vector<4x32xf32>
    %c5_i32 = arith.constant 5 : i32
    %cst_27 = arith.constant dense<0.000000e+00> : vector<4x32xf32>
    %43 = tpu.matmul %42, %11, %cst_27 {dimension_numbers = #tpu.dot_dimension_numbers<[1], [0], [0], [1], [0, 0, 1, 1], [], []>} : vector<4x32xf32>, vector<32x32xf32>, vector<4x32xf32> -> vector<4x32xf32>
    %44 = arith.index_cast %c5_i32 : i32 to index
    %c0_28 = arith.constant 0 : index
    %c0_29 = arith.constant 0 : index
    %45 = vector.load %arg9[%44, %c0_28, %c0_29] : memref<8x4x32xf32, #tpu.memory_space<vmem>>, vector<1x4x32xf32>
    %46 = vector.shape_cast %45 : vector<1x4x32xf32> to vector<4x32xf32>
    %47 = arith.addf %43, %46 : vector<4x32xf32>
    %48 = math.tanh %47 : vector<4x32xf32>
    %c6_i32 = arith.constant 6 : i32
    %cst_30 = arith.constant dense<0.000000e+00> : vector<4x32xf32>
    %49 = tpu.matmul %48, %11, %cst_30 {dimension_numbers = #tpu.dot_dimension_numbers<[1], [0], [0], [1], [0, 0, 1, 1], [], []>} : vector<4x32xf32>, vector<32x32xf32>, vector<4x32xf32> -> vector<4x32xf32>
    %50 = arith.index_cast %c6_i32 : i32 to index
    %c0_31 = arith.constant 0 : index
    %c0_32 = arith.constant 0 : index
    %51 = vector.load %arg9[%50, %c0_31, %c0_32] : memref<8x4x32xf32, #tpu.memory_space<vmem>>, vector<1x4x32xf32>
    %52 = vector.shape_cast %51 : vector<1x4x32xf32> to vector<4x32xf32>
    %53 = arith.addf %49, %52 : vector<4x32xf32>
    %54 = math.tanh %53 : vector<4x32xf32>
    %c7_i32 = arith.constant 7 : i32
    %c0_33 = arith.constant 0 : index
    %c0_34 = arith.constant 0 : index
    %55 = vector.load %arg5[%c0_33, %c0_34] : memref<32x4xf32, #tpu.memory_space<vmem>>, vector<32x4xf32>
    %cst_35 = arith.constant dense<0.000000e+00> : vector<4x4xf32>
    %56 = tpu.matmul %54, %55, %cst_35 {dimension_numbers = #tpu.dot_dimension_numbers<[1], [0], [0], [1], [0, 0, 1, 1], [], []>} : vector<4x32xf32>, vector<32x4xf32>, vector<4x4xf32> -> vector<4x4xf32>
    %c7 = arith.constant 7 : index
    %c0_36 = arith.constant 0 : index
    %c0_37 = arith.constant 0 : index
    %57 = vector.load %arg0[%c7, %c0_36, %c0_37] : memref<8x4x1xf32, #tpu.memory_space<vmem>>, vector<1x4x1xf32>
    %58 = vector.shape_cast %57 : vector<1x4x1xf32> to vector<4x1xf32>
    %c0_38 = arith.constant 0 : index
    %c0_39 = arith.constant 0 : index
    %59 = vector.load %arg4[%c0_38, %c0_39] : memref<1x4xf32, #tpu.memory_space<vmem>>, vector<1x4xf32>
    %60 = vector.broadcast %58 : vector<4x1xf32> to vector<4x4xf32>
    %61 = vector.broadcast %59 : vector<1x4xf32> to vector<4x4xf32>
    %62 = arith.mulf %60, %61 : vector<4x4xf32>
    %63 = arith.addf %56, %62 : vector<4x4xf32>
    %c0_40 = arith.constant 0 : index
    %c0_41 = arith.constant 0 : index
    %64 = vector.load %arg6[%c0_40, %c0_41] : memref<1x4xf32, #tpu.memory_space<vmem>>, vector<1x4xf32>
    %65 = vector.broadcast %64 : vector<1x4xf32> to vector<4x4xf32>
    %66 = arith.addf %63, %65 : vector<4x4xf32>
    %c0_42 = arith.constant 0 : index
    %c0_43 = arith.constant 0 : index
    %67 = vector.load %arg8[%c0_42, %c0_43] : memref<4x4xf32, #tpu.memory_space<vmem>>, vector<4x4xf32>
    tpu.vector_store %arg8[%c0_42, %c0_43], %66 {strides = array<i32>} : memref<4x4xf32, #tpu.memory_space<vmem>>, vector<4x4xf32>,
    return
  }
}

</mosaic_0001>

<bundles_post_ra>
// kernel: tpu_custom_call.1
= control target key start
LH: loop header
LB: loop body
LE: loop exit
PB: predicated region body
PF: predicated region fallthrough
CT: control target
= control target key end

     0   :  { %v418_v3 = vmov 0   ;;  %s549_s0 = inlined_call_operand.vmem [shape: f32[8,4,1], index: 0, kind: input, shape index: {}]   ;;  %s550_s1 = inlined_call_operand.vmem [shape: f32[1,32], index: 1, kind: input, shape index: {}]   ;;  %s551_s2 = inlined_call_operand.vmem [shape: f32[32,32], index: 2, kind: input, shape index: {}]   ;;  %s552_s3 = inlined_call_operand.vmem [shape: f32[1,32], index: 3, kind: input, shape index: {}]   ;;  %s553_s4 = inlined_call_operand.vmem [shape: f32[1,4], index: 4, kind: input, shape index: {}]   ;;  %s554_s5 = inlined_call_operand.vmem [shape: f32[32,4], index: 5, kind: input, shape index: {}]   ;;  %s555_s6 = inlined_call_operand.vmem [shape: f32[1,4], index: 6, kind: input, shape index: {}]   ;;  %s556_s7 = inlined_call_operand.vmem [shape: f32[4,32], index: 7, kind: input, shape index: {}]   ;;  %s557_s8 = inlined_call_operand.hbm [shape: f32[4,4], index: 8, kind: output, shape index: {}]  }
   0x1   :  { %v114_v0 = vld [vmem:[%s551_s2 + $0x18] sm:$0xff]  ;;  %v30_v1 = vld [vmem:[%s549_s0] sm:$0xf]  ;;  %v113_v2 = vld [vmem:[%s551_s2 + $0x10] sm:$0xff]  ;;  %371 = vset.pattern.permute.xlu0 %v418_v3  ;;  %372 = vset.pattern.permute.xlu1 %v418_v3 }
   0x2   :  { %133 = vmatpush.msra.mxu0 %v114_v0  ;;  %41 = vperm.xlu0 %371, %v30_v1   ;;  %v112_v4 = vld [vmem:[%s551_s2 + $0x8] sm:$0xff]  ;;  %v111_v5 = vld [vmem:[%s551_s2] sm:$0xff] }
   0x3   :  { %159 = vmatpush.msra.mxu1 %v114_v0  ;;  %185 = vmatpush.msra.mxu2 %v114_v0 }
   0x4   :  { %134 = vmatpush.msra.mxu0 %v113_v2 }
   0x5   :  { %160 = vmatpush.msra.mxu1 %v113_v2 }
   0x6   :  { %13 = vsyncpa [#allocation4], 0  ;;  %135 = vmatpush.msra.mxu0 %v112_v4  ;;  %v115_v6 = vld [vmem:[%s556_s7] sm:$0xf]  ;;  %vm117_vm0 = vcmask 261120   ;;  %211 = vmatpush.msra.mxu3 %v114_v0  ;;  %vm102_vm1 = vcmask 257024  }
   0x7   :  { %161 = vmatpush.msra.mxu1 %v112_v4  ;;  %186 = vmatpush.msra.mxu2 %v113_v2  ;;  %v31_v7 = vld [vmem:[%s549_s0 + $0x4] sm:$0xf]  ;;  %v36_v8 = vld [vmem:[%s549_s0 + $0x18] sm:$0xf]  ;;  %v32_v9 = vld [vmem:[%s549_s0 + $0x8] sm:$0xf] }
   0x8   :  { %136 = vmatpush.msra.mxu0 %v111_v5  ;;  %212 = vmatpush.msra.mxu3 %v113_v2  ;;  %v374_v10 = vld [vmem:[%s550_s1] ss:$0 sm:$0xff]  ;;  %v33_v25 = vld [vmem:[%s549_s0 + $0xc] sm:$0xf]  ;;  %v367_v26 = vld [vmem:[%s549_s0 + $0x1c] sm:$0xf] }
   0x9   :  { %360 = vmatmul.msk.f32.vlgmr.msra.gmra.mxu0 %vm117_vm0, %v115_v6  ;;  %162 = vmatpush.msra.mxu1 %v111_v5  ;;  %v375_v11 = vld [vmem:[%s552_s3] ss:$0 sm:$0xff]  ;;  %v34_v41 = vld [vmem:[%s549_s0 + $0x10] sm:$0xf]  ;;  %v35_v42 = vld [vmem:[%s549_s0 + $0x14] sm:$0xf] }
   0xa   :  { %187 = vmatpush.msra.mxu2 %v112_v4  ;;  %213 = vmatpush.msra.mxu3 %v112_v4  ;;  %v37_v43 = vld [vmem:[%s549_s0 + $0x1c] sm:$0xf]  ;;  %v299_v1 = vld [vmem:[%s554_s5 + $0x8] sm:$0xff]  ;;  %s351_s23 = sshll.u32 %s557_s8, 4  ;;  %vm342_vm2 = vcmask 27648   ;;  %s352_s23 = int_to_ptr.hbm [resolvable:$true] %s351_s23 }
   0xb   :  { %46 = vperm.xlu0 %371, %v31_v7   ;;  %237 = vmatpush.msrb.mxu0 %v114_v0  ;;  %v301_v63 = vld [vmem:[%s554_s5 + $0x18] sm:$0xff]  ;;  %v376_v7 = vld [vmem:[%s553_s4] ss:$0 sm:$0xff] }
   0xc   :  { %188 = vmatpush.msra.mxu2 %v111_v5  ;;  %214 = vmatpush.msra.mxu3 %v111_v5 }
   0xd   :  { %238 = vmatpush.msrb.mxu0 %v113_v2  ;;  %373 = vset.pattern.permute.xlu2 %v418_v3 }
   0xe   :  { %263 = vmatpush.msrb.mxu1 %v114_v0  ;;  %289 = vmatpush.msrb.mxu2 %v114_v0  ;;  %v300_v0 = vld [vmem:[%s554_s5 + $0x10] sm:$0xff] }
   0xf   :  { %239 = vmatpush.msrb.mxu0 %v112_v4  ;;  %51 = vperm.xlu1 %372, %v32_v9  }
  0x10   :  { %264 = vmatpush.msrb.mxu1 %v113_v2  ;;  %290 = vmatpush.msrb.mxu2 %v113_v2  ;;  %v298_v2 = vld [vmem:[%s554_s5] sm:$0xff]  ;;  %s419_s5 = smov [#allocation3]  }
  0x11   :  { %240 = vmatpush.msrb.mxu0 %v111_v5  ;;  %61 = vperm.xlu2 %373, %v34_v41   ;;  %s349_s20 = sshll.u32 %s419_s5, 4  ;;  %s350_s20 = int_to_ptr.vmem [resolvable:$true] %s349_s20 }
  0x12   :  { %265 = vmatpush.msrb.mxu1 %v112_v4  ;;  %291 = vmatpush.msrb.mxu2 %v112_v4 }
  0x13   :  { %71 = vperm.xlu0 %371, %v36_v8   ;;  %329 = vmatpush.msrb.mxu3 %v301_v63 }
  0x14   :  { %266 = vmatpush.msrb.mxu1 %v111_v5  ;;  %292 = vmatpush.msrb.mxu2 %v111_v5 }
  0x15   :  { %330 = vmatpush.msrb.mxu3 %v300_v0 }
  0x17   :  { %56 = vperm.xlu1 %372, %v33_v25   ;;  %331 = vmatpush.msrb.mxu3 %v299_v1 }
  0x19   :  { %66 = vperm.xlu2 %373, %v35_v42   ;;  %332 = vmatpush.msrb.mxu3 %v298_v2 }
  0x1f   :  { %307 = vperm.xlu1 %372, %v367_v26  }
  0x21   :  { %76 = vperm.xlu2 %373, %v37_v43  }
  0x6b   :  { %v62_v48 = vpop.permute.xlu2 %61 }
  0x6c   :  { %v86_v49 = vmul.f32 %v374_v10, %v62_v48 }
  0x6e   :  { %v98_v50 = vadd.f32 %v375_v11, %v86_v49 }
  0x70   :  { %107 = vst.msk [vmem:[#allocation2 + $0x10] sm:$0xf] %vm102_vm1, %v98_v50 }
  0x73   :  { %v67_v51 = vpop.permute.xlu2 %66 }
  0x74   :  { %v42_v12 = vpop.permute.xlu0 %41  ;;  %v87_v52 = vmul.f32 %v374_v10, %v67_v51 }
  0x75   :  { %v82_v13 = vmul.f32 %v374_v10, %v42_v12 }
  0x76   :  { %v99_v53 = vadd.f32 %v375_v11, %v87_v52 }
  0x77   :  { %v94_v14 = vadd.f32 %v375_v11, %v82_v13  ;;  %v221_v55 = vld [vmem:[#allocation2 + $0x10] sm:$0xf] }
  0x78   :  { %108 = vst.msk [vmem:[#allocation2 + $0x14] sm:$0xf] %vm102_vm1, %v99_v53 }
  0x79   :  { %103 = vst.msk [vmem:[#allocation2] sm:$0xf] %vm102_vm1, %v94_v14 }
  0x7b   :  { %v77_v54 = vpop.permute.xlu2 %76 }
  0x7d   :  { %v47_v15 = vpop.permute.xlu0 %46 }
  0x7e   :  { %v83_v16 = vmul.f32 %v374_v10, %v47_v15 }
  0x7f   :  { %v247_v59 = vld [vmem:[#allocation2 + $0x14] sm:$0xf] }
  0x80   :  { %v95_v17 = vadd.f32 %v375_v11, %v83_v16  ;;  %v116_v18 = vld [vmem:[#allocation2] sm:$0xf] }
  0x81   :  { %v52_v27 = vpop.permute.xlu1 %51 }
  0x82   :  { %104 = vst.msk [vmem:[#allocation2 + $0x4] sm:$0xf] %vm102_vm1, %v95_v17  ;;  %v84_v28 = vmul.f32 %v374_v10, %v52_v27 }
  0x84   :  { %v96_v29 = vadd.f32 %v375_v11, %v84_v28 }
  0x85   :  { %v72_v19 = vpop.permute.xlu0 %71 }
  0x86   :  { %v88_v20 = vmul.f32 %v374_v10, %v72_v19  ;;  %v138_v21 = vpop.f32.mrf.mxu0  ;;  %105 = vst.msk [vmem:[#allocation2 + $0x8] sm:$0xf] %vm102_vm1, %v96_v29 }
  0x87   :  { %v139_v22 = vadd.f32 %v138_v21, %v116_v18 }
  0x88   :  { %v100_v23 = vadd.f32 %v375_v11, %v88_v20 }
  0x89   :  { %378 = vtanh.f32 %v139_v22  ;;  %v143_v30 = vld [vmem:[#allocation2 + $0x4] sm:$0xf]  ;;  %v57_v34 = vpop.permute.xlu1 %56 }
  0x8a   :  { %109 = vst.msk [vmem:[#allocation2 + $0x18] sm:$0xf] %vm102_vm1, %v100_v23  ;;  %v85_v35 = vmul.f32 %v374_v10, %v57_v34  ;;  %v377_v10 = vld [vmem:[%s555_s6] ss:$0 sm:$0xff] }
  0x8c   :  { %v97_v36 = vadd.f32 %v375_v11, %v85_v35 }
  0x8d   :  { %v169_v37 = vld [vmem:[#allocation2 + $0x8] sm:$0xf] }
  0x8e   :  { %106 = vst.msk [vmem:[#allocation2 + $0xc] sm:$0xf] %vm102_vm1, %v97_v36 }
  0x8f   :  { %v379_v24 = vpop.eup %378 }
  0x90   :  { %361 = vmatmul.msk.f32.vlgmr.msra.gmra.mxu1 %vm117_vm0, %v379_v24 }
  0x91   :  { %v273_v3 = vld [vmem:[#allocation2 + $0x18] sm:$0xf]  ;;  %v308_v8 = vpop.permute.xlu1 %307 }
  0x92   :  { %v313_v9 = vmul.f32 %v376_v7, %v308_v8 }
  0x95   :  { %v195_v44 = vld [vmem:[#allocation2 + $0xc] sm:$0xf] }
 0x10d   :  { %v164_v31 = vpop.f32.mrf.mxu1 }
 0x10e   :  { %v165_v32 = vadd.f32 %v164_v31, %v143_v30 }
 0x110   :  { %380 = vtanh.f32 %v165_v32 }
 0x116   :  { %v381_v33 = vpop.eup %380 }
 0x117   :  { %362 = vmatmul.msk.f32.vlgmr.msra.gmra.mxu2 %vm117_vm0, %v381_v33 }
 0x19a   :  { %v190_v38 = vpop.f32.mrf.mxu2 }
 0x19b   :  { %v191_v39 = vadd.f32 %v190_v38, %v169_v37 }
 0x19d   :  { %382 = vtanh.f32 %v191_v39 }
 0x1a3   :  { %v383_v40 = vpop.eup %382 }
 0x1a4   :  { %363 = vmatmul.msk.f32.vlgmr.msra.gmra.mxu3 %vm117_vm0, %v383_v40 }
 0x227   :  { %v216_v45 = vpop.f32.mrf.mxu3 }
 0x228   :  { %v217_v46 = vadd.f32 %v216_v45, %v195_v44 }
 0x22a   :  { %384 = vtanh.f32 %v217_v46 }
 0x230   :  { %v385_v47 = vpop.eup %384 }
 0x231   :  { %364 = vmatmul.msk.f32.vlgmr.msrb.gmra.mxu0 %vm117_vm0, %v385_v47 }
 0x2ae   :  { %v242_v56 = vpop.f32.mrf.mxu0 }
 0x2af   :  { %v243_v57 = vadd.f32 %v242_v56, %v221_v55 }
 0x2b1   :  { %386 = vtanh.f32 %v243_v57 }
 0x2b7   :  { %v387_v58 = vpop.eup %386 }
 0x2b8   :  { %365 = vmatmul.msk.f32.vlgmr.msrb.gmra.mxu1 %vm117_vm0, %v387_v58 }
 0x335   :  { %v268_v60 = vpop.f32.mrf.mxu1 }
 0x336   :  { %v269_v61 = vadd.f32 %v268_v60, %v247_v59 }
 0x338   :  { %388 = vtanh.f32 %v269_v61 }
 0x33e   :  { %v389_v62 = vpop.eup %388 }
 0x33f   :  { %366 = vmatmul.msk.f32.vlgmr.msrb.gmra.mxu2 %vm117_vm0, %v389_v62 }
 0x3c2   :  { %v294_v4 = vpop.f32.mrf.mxu2 }
 0x3c3   :  { %v295_v5 = vadd.f32 %v294_v4, %v273_v3 }
 0x3c5   :  { %390 = vtanh.f32 %v295_v5 }
 0x3cb   :  { %v391_v6 = vpop.eup %390 }
 0x3cc   :  { %368 = vmatmul.msk.f32.vlgmr.msrb.gmra.mxu3 %vm117_vm0, %v391_v6 }
 0x44f   :  { %v334_v11 = vpop.f32.mrf.mxu3 }
 0x450   :  { %v335_v12 = vadd.f32 %v334_v11, %v313_v9 }
 0x452   :  { %v341_v13 = vadd.f32 %v377_v10, %v335_v12 }
 0x454   :  { %343 = vst.msk [vmem:[#allocation3] sm:$0xf] %vm342_vm2, %v341_v13 }
 0x455   :  { %354 = dma.vmem_to_hbm [thread:$0]  %s350_s20, 64, %s352_s23, [#allocation4]  }
 0x456   :  { %416 = dma.done.wait [#allocation4], 64  }
 0x457   :  { %417 = vsyncadd [#allocation4], 4294967232 }
 0x458   :  { %359 = vsyncpa [#allocation4], 1 }

</bundles_post_ra>
